<compile_context>
chip_gen: v7x
topology: tpu7x:2x2x1
jax: 0.10.0
libtpu: 0.0.40
codegen_flags: <defaults>
</compile_context>

<pallas_src>
import functools

import jax
import jax.numpy as jnp
from jax.experimental import pallas as pl
from jax.experimental.pallas import tpu as pltpu

_LANE = 128
_MIB = 2 ** 20


def _round_up(x, m):
    return ((x + m - 1) // m) * m


def _vmem_cap_bytes():
    """~80% of this generation's physical VMEM.

    v5e/v6e have 128 MiB per TensorCore, v7x only 64 MiB.  If the query is
    unavailable, fall back to 64 MiB so the requested limit is valid everywhere.
    """
    cap = 64 * _MIB
    try:
        cap = int(getattr(pltpu.get_tpu_info(), "vmem_capacity_bytes", cap))
    except Exception:
        pass
    return int(0.8 * cap)


def _mlp_kernel(x_ref, w1_ref, b1_ref, w2_hbm, b2_ref, w3_hbm, b3_ref, o_ref,
                w2_vmem, w3_vmem, sem):
    """Fused 3-layer MLP forward for one batch tile.

    x_ref : (tb, C_in)            VMEM (bf16 or f32), auto-pipelined per tile
    w1_ref: (C_in, 2*C_in)        VMEM, resident (Buffered(1))
    b1_ref: (1, 2*C_in)  f32      VMEM, resident
    w2_hbm: (2*C_in, H)           HBM ref (manual DMA -> w2_vmem)
    b2_ref: (1, H)       f32      VMEM, resident
    w3_hbm: (H, C_out_p)          HBM ref (manual DMA -> w3_vmem)
    b3_ref: (1, C_out_p) f32      VMEM, resident
    o_ref : (tb, C_out_p)         VMEM output tile (lane-dense, unmasked stores)
    w2_vmem/w3_vmem               persistent VMEM scratch for the big weights
    sem   : DMA semaphores (2,)
    """
    first_step = pl.program_id(0) == 0

    # Step 0 only: kick off the layer-2/3 weight DMAs so they overlap with the
    # layer-1 matmul below.  Scratch persists across grid steps, so later steps
    # reuse the already-resident weights (no re-fetch, no wait).
    @pl.when(first_step)
    def _():
        pltpu.make_async_copy(w2_hbm, w2_vmem, sem.at[0]).start()
        pltpu.make_async_copy(w3_hbm, w3_vmem, sem.at[1]).start()

    # Layer 1: MXU matmul with f32 accumulation; bias + ReLU on the VPU.
    x = x_ref[...].astype(w1_ref.dtype)
    h1 = jnp.dot(x, w1_ref[...], preferred_element_type=jnp.float32) + b1_ref[...]
    h1 = jnp.maximum(h1, 0.0).astype(w2_vmem.dtype)

    @pl.when(first_step)
    def _():
        pltpu.make_async_copy(w2_hbm, w2_vmem, sem.at[0]).wait()

    # Layer 2.
    h2 = jnp.dot(h1, w2_vmem[...], preferred_element_type=jnp.float32) + b2_ref[...]
    h2 = jnp.maximum(h2, 0.0).astype(w3_vmem.dtype)

    @pl.when(first_step)
    def _():
        pltpu.make_async_copy(w3_hbm, w3_vmem, sem.at[1]).wait()

    # Layer 3 (output padded to a lane-dense multiple of 128 -> unmasked vst).
    out = jnp.dot(h2, w3_vmem[...], preferred_element_type=jnp.float32) + b3_ref[...]
    o_ref[...] = out.astype(o_ref.dtype)


@functools.partial(jax.jit, static_argnames=("out_channels", "block_b"))
def classifier_forward(x, w1, b1, w2, b2, w3, b3, *, out_channels=None, block_b=None):
    B, c_in = x.shape
    c_h1 = w1.shape[1]
    c_h2 = w2.shape[1]
    if out_channels is None:
        out_channels = w3.shape[1]
    out_dtype = x.dtype

    # Lane-dense final layer: w3/b3 are expected to be pre-padded to a multiple
    # of 128 columns (init_classifier_params does this); pad only as a fallback.
    c_out_p = _round_up(max(out_channels, w3.shape[1]), _LANE)
    if w3.shape[1] != c_out_p:
        w3 = jnp.pad(w3, ((0, 0), (0, c_out_p - w3.shape[1])))
        b3 = jnp.pad(b3, ((0, 0), (0, c_out_p - b3.shape[1])))

    # Ship the input in the (narrower) weight dtype: halves x HBM traffic and
    # feeds the native bf16 MXU path directly.
    if jnp.dtype(w1.dtype).itemsize < jnp.dtype(x.dtype).itemsize:
        x = x.astype(w1.dtype)

    # Batch tile: one big MXU-friendly tile (512 is a multiple of the 256-wide
    # MXU granule on v6e/v7x and of 128 on v5e).  Weights are fetched once and
    # kept resident, so fewer grid steps is strictly better on single-TC chips
    # and avoids duplicating the weight fetch per core.
    # TODO(synk): add a "parallel"-batch-axis variant (auto-pipelined weights,
    # no program_id==0 guard) for very large B on dual-TC chips (v7x), where
    # compute dominates and sharding the batch pays for duplicated weight DMA.
    if block_b is None:
        block_b = B if B <= 512 else 512
    block_b = min(block_b, B)

    grid = (pl.cdiv(B, block_b),)
    # NOTE: a partial last tile reads garbage rows past B.  Benign for a
    # row-wise MLP (those output rows are clipped on store / discarded), but do
    # not add any reduction over the batch axis without masking them.

    # VMEM budget: single-buffered resident weights + manual weight scratch +
    # double-buffered x/out tiles + f32 activations, capped at ~80% of physical
    # VMEM for this generation.
    isz = lambda a: jnp.dtype(a.dtype).itemsize
    resident_bytes = c_in * c_h1 * isz(w1) + (c_h1 + c_h2 + c_out_p) * isz(b1)
    scratch_bytes = c_h1 * c_h2 * isz(w2) + c_h2 * c_out_p * isz(w3)
    io_bytes = 2 * block_b * (c_in * isz(x) + c_out_p * jnp.dtype(out_dtype).itemsize)
    act_bytes = block_b * (c_h1 + c_h2) * (4 + isz(w1))
    est = resident_bytes + scratch_bytes + io_bytes + act_bytes
    vmem_limit = int(min(_vmem_cap_bytes(), max(32 * _MIB, int(1.5 * est))))
    # TODO(synk): if `est` exceeds the VMEM cap (e.g. in_channels >= 4096 on
    # v7x's 64 MiB VMEM), fall back to a K/N-tiled grid ("arbitrary" reduction
    # axis last, f32 accumulator) instead of keeping all weights resident.

    # Grid-invariant (constant index_map) operands: DMA'd once, kept resident,
    # single-buffered -- no point double-buffering a block that never changes.
    def resident(shape):
        return pl.BlockSpec(shape, lambda i: (0,) * len(shape),
                            pipeline_mode=pl.Buffered(buffer_count=1))

    out_padded = pl.pallas_call(
        _mlp_kernel,
        out_shape=jax.ShapeDtypeStruct((B, c_out_p), out_dtype),
        grid_spec=pltpu.PrefetchScalarGridSpec(
            num_scalar_prefetch=0,
            grid=grid,
            in_specs=[
                pl.BlockSpec((block_b, c_in), lambda i: (i, 0)),  # x tile (pipelined)
                resident((c_in, c_h1)),                           # w1 (resident, 1 buf)
                resident((1, c_h1)),                              # b1
                pl.BlockSpec(memory_space=pl.ANY),                # w2 (HBM, manual DMA)
                resident((1, c_h2)),                              # b2
                pl.BlockSpec(memory_space=pl.ANY),                # w3 (HBM, manual DMA)
                resident((1, c_out_p)),                           # b3
            ],
            out_specs=pl.BlockSpec((block_b, c_out_p), lambda i: (i, 0)),
            scratch_shapes=[
                pltpu.VMEM((c_h1, c_h2), w2.dtype),     # persistent w2 copy
                pltpu.VMEM((c_h2, c_out_p), w3.dtype),  # persistent w3 copy
                pltpu.SemaphoreType.DMA((2,)),
            ],
        ),
        compiler_params=pltpu.CompilerParams(
            dimension_semantics=("arbitrary",),
            vmem_limit_bytes=vmem_limit,
        ),
    )(x, w1, b1, w2, b2, w3, b3)

    # Slice the zero-padded columns back off (cheap; fuse into consumer if any).
    if out_channels < c_out_p:
        return out_padded[:, :out_channels]
    return out_padded


def init_classifier_params(key, in_channels=1024, hidden=1024, out_channels=2,
                           weight_dtype=jnp.bfloat16, bias_dtype=jnp.float32):
    """Matches Classifier.__initialize_weights: Linear weights ~ N(0, 0.1), bias = 0.

    Weights are stored as (in, out) == PyTorch weight.T.  The final layer is
    zero-padded to a multiple of 128 output columns once here (lane-dense
    stores in the kernel, no per-call jnp.pad).  Default weight dtype is bf16
    (native MXU dtype, half the HBM/VMEM traffic); pass weight_dtype=jnp.float32
    to match the f32 PyTorch model more closely.
    """
    k1, k2, k3 = jax.random.split(key, 3)
    std = 0.1
    c_out_p = _round_up(out_channels, _LANE)
    w1 = (jax.random.normal(k1, (in_channels, 2 * in_channels), jnp.float32) * std
          ).astype(weight_dtype)
    b1 = jnp.zeros((1, 2 * in_channels), bias_dtype)
    w2 = (jax.random.normal(k2, (2 * in_channels, hidden), jnp.float32) * std
          ).astype(weight_dtype)
    b2 = jnp.zeros((1, hidden), bias_dtype)
    w3 = jnp.zeros((hidden, c_out_p), jnp.float32)
    w3 = w3.at[:, :out_channels].set(
        jax.random.normal(k3, (hidden, out_channels), jnp.float32) * std)
    w3 = w3.astype(weight_dtype)
    b3 = jnp.zeros((1, c_out_p), bias_dtype)
    return w1, b1, w2, b2, w3, b3


def classifier_reference(x, w1, b1, w2, b2, w3, b3):
    """Pure-JAX reference with the same mixed-precision contract as the kernel."""
    wdt = w1.dtype
    h1 = jnp.maximum(
        jnp.dot(x.astype(wdt), w1, preferred_element_type=jnp.float32) + b1, 0.0)
    h2 = jnp.maximum(
        jnp.dot(h1.astype(wdt), w2, preferred_element_type=jnp.float32) + b2, 0.0)
    out = jnp.dot(h2.astype(wdt), w3, preferred_element_type=jnp.float32) + b3
    return out.astype(x.dtype)


if __name__ == "__main__":
    # Small shapes consistent with the module (scaled down from the defaults
    # in=1024, hidden=1024, out=2).
    B, IN_CH, HIDDEN, OUT_CH = 256, 128, 128, 2

    key = jax.random.PRNGKey(0)
    k_x, k_p = jax.random.split(key)

    x = jax.random.normal(k_x, (B, IN_CH), dtype=jnp.float32)
    params = init_classifier_params(k_p, IN_CH, HIDDEN, OUT_CH)

    ref = classifier_reference(x, *params)[:, :OUT_CH]

    # Default tiling: one batch tile, grid=(1,), weight DMAs overlap layer 1.
    out = jax.block_until_ready(classifier_forward(x, *params, out_channels=OUT_CH))
    assert out.shape == (B, OUT_CH), out.shape
    assert jnp.allclose(out, ref, atol=2e-2, rtol=2e-2), (
        f"mismatch vs reference (single tile), max abs diff = "
        f"{jnp.max(jnp.abs(out - ref))}")

    # Multi-step grid (incl. a partial last tile): exercises weight residency
    # across grid steps (manual DMA only on step 0) and clipped partial stores.
    out_mt = jax.block_until_ready(
        classifier_forward(x, *params, out_channels=OUT_CH, block_b=96))
    assert out_mt.shape == (B, OUT_CH), out_mt.shape
    assert jnp.allclose(out_mt, ref, atol=2e-2, rtol=2e-2), (
        f"mismatch vs reference (multi tile), max abs diff = "
        f"{jnp.max(jnp.abs(out_mt - ref))}")

    print("KERNEL_OK")
</pallas_src>

<mosaic_0001>
module attributes {stable_mosaic.version = 11 : i64} {
  func.func @_mlp_kernel(%arg0: i32, %arg1: memref<256x128xbf16, #tpu.memory_space<vmem>>, %arg2: memref<128x256xbf16, #tpu.memory_space<vmem>>, %arg3: memref<1x256xf32, #tpu.memory_space<vmem>>, %arg4: memref<256x128xbf16, #tpu.memory_space<any>>, %arg5: memref<1x128xf32, #tpu.memory_space<vmem>>, %arg6: memref<128x128xbf16, #tpu.memory_space<any>>, %arg7: memref<1x128xf32, #tpu.memory_space<vmem>>, %arg8: memref<256x128xf32, #tpu.memory_space<vmem>>, %arg9: memref<256x128xbf16, #tpu.memory_space<vmem>>, %arg10: memref<128x128xbf16, #tpu.memory_space<vmem>>, %arg11: memref<2x!tpu.dma_semaphore, #tpu.memory_space<semaphore_mem>>) attributes {dimension_semantics = [#tpu.dimension_semantics<arbitrary>], iteration_bounds = array<i64: 1>, scalar_prefetch = 0 : i64, scratch_operands = 3 : i64, tpu.core_type = #tpu.core_type<tc>, window_params = [{transform_indices = @transform_0, window_bounds = array<i64: 256, 128>}, {pipeline_mode = #tpu.pipeline_mode<synchronous>, transform_indices = @transform_1, window_bounds = array<i64: 128, 256>}, {pipeline_mode = #tpu.pipeline_mode<synchronous>, transform_indices = @transform_2, window_bounds = array<i64: 1, 256>}, {}, {pipeline_mode = #tpu.pipeline_mode<synchronous>, transform_indices = @transform_4, window_bounds = array<i64: 1, 128>}, {}, {pipeline_mode = #tpu.pipeline_mode<synchronous>, transform_indices = @transform_6, window_bounds = array<i64: 1, 128>}, {transform_indices = @transform_7, window_bounds = array<i64: 256, 128>}]} {
    %c0_i32 = arith.constant 0 : i32
    %0 = arith.cmpi eq, %arg0, %c0_i32 : i32
    %1 = arith.extui %0 : i1 to i32
    %c0_i32_0 = arith.constant 0 : i32
    %2 = arith.cmpi ne, %1, %c0_i32_0 : i32
    scf.if %2 {
      %c0_i32_22 = arith.constant 0 : i32
      %30 = tpu.memref_slice %arg11[%c0_i32_22] : memref<2x!tpu.dma_semaphore, #tpu.memory_space<semaphore_mem>> -> memref<1x!tpu.dma_semaphore, #tpu.memory_space<semaphore_mem>>
      %31 = tpu.memref_squeeze %30 : memref<1x!tpu.dma_semaphore, #tpu.memory_space<semaphore_mem>> -> memref<!tpu.dma_semaphore, #tpu.memory_space<semaphore_mem>>
      tpu.enqueue_dma source(%arg4 : memref<256x128xbf16, #tpu.memory_space<any>>) target(%arg9 : memref<256x128xbf16, #tpu.memory_space<vmem>>) target_semaphore(%31 : memref<!tpu.dma_semaphore, #tpu.memory_space<semaphore_mem>>)
      %c1_i32 = arith.constant 1 : i32
      %32 = tpu.memref_slice %arg11[%c1_i32] : memref<2x!tpu.dma_semaphore, #tpu.memory_space<semaphore_mem>> -> memref<1x!tpu.dma_semaphore, #tpu.memory_space<semaphore_mem>>
      %33 = tpu.memref_squeeze %32 : memref<1x!tpu.dma_semaphore, #tpu.memory_space<semaphore_mem>> -> memref<!tpu.dma_semaphore, #tpu.memory_space<semaphore_mem>>
      tpu.enqueue_dma source(%arg6 : memref<128x128xbf16, #tpu.memory_space<any>>) target(%arg10 : memref<128x128xbf16, #tpu.memory_space<vmem>>) target_semaphore(%33 : memref<!tpu.dma_semaphore, #tpu.memory_space<semaphore_mem>>)
    } else {
    }
    %c0 = arith.constant 0 : index
    %c0_1 = arith.constant 0 : index
    %3 = vector.load %arg1[%c0, %c0_1] : memref<256x128xbf16, #tpu.memory_space<vmem>>, vector<256x128xbf16>
    %c0_2 = arith.constant 0 : index
    %c0_3 = arith.constant 0 : index
    %4 = vector.load %arg2[%c0_2, %c0_3] : memref<128x256xbf16, #tpu.memory_space<vmem>>, vector<128x256xbf16>
    %cst = arith.constant dense<0.000000e+00> : vector<256x256xf32>
    %5 = tpu.matmul %3, %4, %cst {dimension_numbers = #tpu.dot_dimension_numbers<[1], [0], [0], [1], [0, 0, 1, 1], [], []>} : vector<256x128xbf16>, vector<128x256xbf16>, vector<256x256xf32> -> vector<256x256xf32>
    %c0_4 = arith.constant 0 : index
    %c0_5 = arith.constant 0 : index
    %6 = vector.load %arg3[%c0_4, %c0_5] : memref<1x256xf32, #tpu.memory_space<vmem>>, vector<1x256xf32>
    %7 = vector.broadcast %6 : vector<1x256xf32> to vector<256x256xf32>
    %8 = arith.addf %5, %7 : vector<256x256xf32>
    %cst_6 = arith.constant 0.000000e+00 : f32
    %9 = vector.broadcast %cst_6 : f32 to vector<256x256xf32>
    %10 = arith.maximumf %8, %9 : vector<256x256xf32>
    %11 = arith.truncf %10 : vector<256x256xf32> to vector<256x256xbf16>
    %12 = arith.extui %0 : i1 to i32
    %c0_i32_7 = arith.constant 0 : i32
    %13 = arith.cmpi ne, %12, %c0_i32_7 : i32
    scf.if %13 {
      %c0_i32_22 = arith.constant 0 : i32
      %30 = tpu.memref_slice %arg11[%c0_i32_22] : memref<2x!tpu.dma_semaphore, #tpu.memory_space<semaphore_mem>> -> memref<1x!tpu.dma_semaphore, #tpu.memory_space<semaphore_mem>>
      %31 = tpu.memref_squeeze %30 : memref<1x!tpu.dma_semaphore, #tpu.memory_space<semaphore_mem>> -> memref<!tpu.dma_semaphore, #tpu.memory_space<semaphore_mem>>
      tpu.wait_dma2 semaphore(%31 : memref<!tpu.dma_semaphore, #tpu.memory_space<semaphore_mem>>) src(%arg4 : memref<256x128xbf16, #tpu.memory_space<any>>) dst(%arg9 : memref<256x128xbf16, #tpu.memory_space<vmem>>)
    } else {
    }
    %c0_8 = arith.constant 0 : index
    %c0_9 = arith.constant 0 : index
    %14 = vector.load %arg9[%c0_8, %c0_9] : memref<256x128xbf16, #tpu.memory_space<vmem>>, vector<256x128xbf16>
    %cst_10 = arith.constant dense<0.000000e+00> : vector<256x128xf32>
    %15 = tpu.matmul %11, %14, %cst_10 {dimension_numbers = #tpu.dot_dimension_numbers<[1], [0], [0], [1], [0, 0, 1, 1], [], []>} : vector<256x256xbf16>, vector<256x128xbf16>, vector<256x128xf32> -> vector<256x128xf32>
    %c0_11 = arith.constant 0 : index
    %c0_12 = arith.constant 0 : index
    %16 = vector.load %arg5[%c0_11, %c0_12] : memref<1x128xf32, #tpu.memory_space<vmem>>, vector<1x128xf32>
    %17 = vector.broadcast %16 : vector<1x128xf32> to vector<256x128xf32>
    %18 = arith.addf %15, %17 : vector<256x128xf32>
    %cst_13 = arith.constant 0.000000e+00 : f32
    %19 = vector.broadcast %cst_13 : f32 to vector<256x128xf32>
    %20 = arith.maximumf %18, %19 : vector<256x128xf32>
    %21 = arith.truncf %20 : vector<256x128xf32> to vector<256x128xbf16>
    %22 = arith.extui %0 : i1 to i32
    %c0_i32_14 = arith.constant 0 : i32
    %23 = arith.cmpi ne, %22, %c0_i32_14 : i32
    scf.if %23 {
      %c1_i32 = arith.constant 1 : i32
      %30 = tpu.memref_slice %arg11[%c1_i32] : memref<2x!tpu.dma_semaphore, #tpu.memory_space<semaphore_mem>> -> memref<1x!tpu.dma_semaphore, #tpu.memory_space<semaphore_mem>>
      %31 = tpu.memref_squeeze %30 : memref<1x!tpu.dma_semaphore, #tpu.memory_space<semaphore_mem>> -> memref<!tpu.dma_semaphore, #tpu.memory_space<semaphore_mem>>
      tpu.wait_dma2 semaphore(%31 : memref<!tpu.dma_semaphore, #tpu.memory_space<semaphore_mem>>) src(%arg6 : memref<128x128xbf16, #tpu.memory_space<any>>) dst(%arg10 : memref<128x128xbf16, #tpu.memory_space<vmem>>)
    } else {
    }
    %c0_15 = arith.constant 0 : index
    %c0_16 = arith.constant 0 : index
    %24 = vector.load %arg10[%c0_15, %c0_16] : memref<128x128xbf16, #tpu.memory_space<vmem>>, vector<128x128xbf16>
    %cst_17 = arith.constant dense<0.000000e+00> : vector<256x128xf32>
    %25 = tpu.matmul %21, %24, %cst_17 {dimension_numbers = #tpu.dot_dimension_numbers<[1], [0], [0], [1], [0, 0, 1, 1], [], []>} : vector<256x128xbf16>, vector<128x128xbf16>, vector<256x128xf32> -> vector<256x128xf32>
    %c0_18 = arith.constant 0 : index
    %c0_19 = arith.constant 0 : index
    %26 = vector.load %arg7[%c0_18, %c0_19] : memref<1x128xf32, #tpu.memory_space<vmem>>, vector<1x128xf32>
    %27 = vector.broadcast %26 : vector<1x128xf32> to vector<256x128xf32>
    %28 = arith.addf %25, %27 : vector<256x128xf32>
    %c0_20 = arith.constant 0 : index
    %c0_21 = arith.constant 0 : index
    %29 = vector.load %arg8[%c0_20, %c0_21] : memref<256x128xf32, #tpu.memory_space<vmem>>, vector<256x128xf32>
    tpu.vector_store %arg8[%c0_20, %c0_21], %28 {strides = array<i32>} : memref<256x128xf32, #tpu.memory_space<vmem>>, vector<256x128xf32>,
    return
  }
  func.func @transform_0(%arg0: i32) -> (i32, i32) {
    %c0_i32 = arith.constant 0 : i32
    %c0_i32_0 = arith.constant 0 : i32
    return %arg0, %c0_i32 : i32, i32
  }
  func.func @transform_1(%arg0: i32) -> (i32, i32) {
    %c0_i32 = arith.constant 0 : i32
    %c0_i32_0 = arith.constant 0 : i32
    %c0_i32_1 = arith.constant 0 : i32
    return %c0_i32, %c0_i32_0 : i32, i32
  }
  func.func @transform_2(%arg0: i32) -> (i32, i32) {
    %c0_i32 = arith.constant 0 : i32
    %c0_i32_0 = arith.constant 0 : i32
    %c0_i32_1 = arith.constant 0 : i32
    return %c0_i32, %c0_i32_0 : i32, i32
  }
  func.func @transform_4(%arg0: i32) -> (i32, i32) {
    %c0_i32 = arith.constant 0 : i32
    %c0_i32_0 = arith.constant 0 : i32
    %c0_i32_1 = arith.constant 0 : i32
    return %c0_i32, %c0_i32_0 : i32, i32
  }
  func.func @transform_6(%arg0: i32) -> (i32, i32) {
    %c0_i32 = arith.constant 0 : i32
    %c0_i32_0 = arith.constant 0 : i32
    %c0_i32_1 = arith.constant 0 : i32
    return %c0_i32, %c0_i32_0 : i32, i32
  }
  func.func @transform_7(%arg0: i32) -> (i32, i32) {
    %c0_i32 = arith.constant 0 : i32
    %c0_i32_0 = arith.constant 0 : i32
    return %arg0, %c0_i32 : i32, i32
  }
}

</mosaic_0001>

<bundles_post_ra>
// kernel: classifier_forward.1
= control target key start
LH: loop header
LB: loop body
LE: loop exit
PB: predicated region body
PF: predicated region fallthrough
CT: control target
= control target key end

     0   :  { %s2116_s0 = inlined_call_operand.vmem [shape: bf16[256,128], index: 0, kind: input, shape index: {}]   ;;  %s2117_s1 = inlined_call_operand.vmem [shape: bf16[128,256], index: 1, kind: input, shape index: {}]   ;;  %s2118_s2 = inlined_call_operand.vmem [shape: f32[1,256], index: 2, kind: input, shape index: {}]   ;;  %s2119_s3 = inlined_call_operand.vmem [shape: bf16[256,128], index: 3, kind: input, shape index: {}]   ;;  %s2120_s4 = inlined_call_operand.vmem [shape: f32[1,128], index: 4, kind: input, shape index: {}]   ;;  %s2121_s5 = inlined_call_operand.vmem [shape: bf16[128,128], index: 5, kind: input, shape index: {}]   ;;  %s2122_s6 = inlined_call_operand.vmem [shape: f32[1,128], index: 6, kind: input, shape index: {}]   ;;  %s2123_s7 = inlined_call_operand.vmem [shape: f32[256,128], index: 7, kind: output, shape index: {}]  }
   0x1   :  { %v1494_v0 = vld [vmem:[%s2119_s3] sm:$0xff]  ;;  %v1499_v1 = vld [vmem:[%s2119_s3 + $0x8] sm:$0xff]  ;;  %v1504_v2 = vld [vmem:[%s2119_s3 + $0x10] sm:$0xff] }
   0x2   :  { %v1509_v3 = vld [vmem:[%s2119_s3 + $0x18] sm:$0xff]  ;;  %v1514_v4 = vld [vmem:[%s2119_s3 + $0x20] sm:$0xff]  ;;  %v1519_v5 = vld [vmem:[%s2119_s3 + $0x28] sm:$0xff] }
   0x3   :  { %v1524_v6 = vld [vmem:[%s2119_s3 + $0x30] sm:$0xff]  ;;  %v1529_v7 = vld [vmem:[%s2119_s3 + $0x38] sm:$0xff]  ;;  %v1534_v8 = vld [vmem:[%s2119_s3 + $0x40] sm:$0xff] }
   0x4   :  { %v1539_v9 = vld [vmem:[%s2119_s3 + $0x48] sm:$0xff]  ;;  %v1544_v10 = vld [vmem:[%s2119_s3 + $0x50] sm:$0xff]  ;;  %v1549_v11 = vld [vmem:[%s2119_s3 + $0x58] sm:$0xff] }
   0x5   :  { %v1554_v12 = vld [vmem:[%s2119_s3 + $0x60] sm:$0xff]  ;;  %v1559_v13 = vld [vmem:[%s2119_s3 + $0x68] sm:$0xff]  ;;  %v1564_v14 = vld [vmem:[%s2119_s3 + $0x70] sm:$0xff] }
   0x6   :  { %v1569_v15 = vld [vmem:[%s2119_s3 + $0x78] sm:$0xff] }
   0x7   :  { %98 = vsyncadd [#allocation4], 2048  ;;  %v1574_v16 = vld [vmem:[%s2121_s5] sm:$0xff]  ;;  %v1579_v17 = vld [vmem:[%s2121_s5 + $0x8] sm:$0xff] }
   0x8   :  { %2132 = vst [vmem:[#allocation9_spill] sm:$0xff] %v1574_v16  ;;  %2133 = vst [vmem:[#allocation10_spill] sm:$0xff] %v1579_v17  ;;  %v1584_v18 = vld [vmem:[%s2121_s5 + $0x10] sm:$0xff]  ;;  %v1589_v19 = vld [vmem:[%s2121_s5 + $0x18] sm:$0xff] }
   0x9   :  { %2134 = vst [vmem:[#allocation11_spill] sm:$0xff] %v1584_v18  ;;  %2135 = vst [vmem:[#allocation12_spill] sm:$0xff] %v1589_v19  ;;  %v1594_v20 = vld [vmem:[%s2121_s5 + $0x20] sm:$0xff]  ;;  %v1599_v21 = vld [vmem:[%s2121_s5 + $0x28] sm:$0xff] }
   0xa   :  { %2136 = vst [vmem:[#allocation13_spill] sm:$0xff] %v1594_v20  ;;  %2137 = vst [vmem:[#allocation14_spill] sm:$0xff] %v1599_v21  ;;  %v1604_v22 = vld [vmem:[%s2121_s5 + $0x30] sm:$0xff]  ;;  %v1609_v23 = vld [vmem:[%s2121_s5 + $0x38] sm:$0xff] }
   0xb   :  { %2138 = vst [vmem:[#allocation15_spill] sm:$0xff] %v1604_v22  ;;  %2139 = vst [vmem:[#allocation16_spill] sm:$0xff] %v1609_v23 }
   0xc   :  { %155 = vsyncadd [#allocation4 + $0x1], 1024  ;;  %v1406_v24 = vld [vmem:[%s2117_s1 + $0x4] ss:$8 sps:$4 sm:$0xff]   ;;  %v1408_v25 = vld [vmem:[%s2117_s1] ss:$8 sps:$4 sm:$0xff]   ;;  %v206_v57 = vlaneseq }
   0xd   :  { %v1450_v26 = vmov 0   ;;  %v1409_v27 = vld [vmem:[%s2117_s1 + $0x14] ss:$8 sps:$4 sm:$0xff]   ;;  %392 = vmatprep.subr.bf16.mxu0 %v1406_v24  ;;  %1389 = vmatprep.subr.bf16.mxu1 %v1406_v24  ;;  %v1411_v28 = vld [vmem:[%s2117_s1 + $0x10] ss:$8 sps:$4 sm:$0xff]   ;;  %v1430_v41 = vld [vmem:[%s2116_s0] sm:$0xff]  }
   0xe   :  { %424 = vmatprep.mubr.bf16.mxu0 %v1450_v26  ;;  %544 = vmatprep.mubr.bf16.mxu1 %v1450_v26  ;;  %v1412_v29 = vld [vmem:[%s2117_s1 + $0x24] ss:$8 sps:$4 sm:$0xff]   ;;  %v1414_v30 = vld [vmem:[%s2117_s1 + $0x20] ss:$8 sps:$4 sm:$0xff]   ;;  %v1415_v31 = vld [vmem:[%s2117_s1 + $0x34] ss:$8 sps:$4 sm:$0xff]  }
   0xf   :  { %393 = vmatpush1.bf16.msra.mxu0 %v1408_v25  ;;  %1397 = vmatpush1.bf16.msra.mxu1 %v1408_v25  ;;  %v1417_v32 = vld [vmem:[%s2117_s1 + $0x30] ss:$8 sps:$4 sm:$0xff]   ;;  %v1418_v33 = vld [vmem:[%s2117_s1 + $0x44] ss:$8 sps:$4 sm:$0xff]   ;;  %v1420_v34 = vld [vmem:[%s2117_s1 + $0x40] ss:$8 sps:$4 sm:$0xff]  }
  0x10   :  { %394 = vmatprep.subr.bf16.mxu0 %v1409_v27  ;;  %1390 = vmatprep.subr.bf16.mxu1 %v1409_v27  ;;  %v1421_v35 = vld [vmem:[%s2117_s1 + $0x54] ss:$8 sps:$4 sm:$0xff]   ;;  %v1423_v36 = vld [vmem:[%s2117_s1 + $0x50] ss:$8 sps:$4 sm:$0xff]   ;;  %v1424_v37 = vld [vmem:[%s2117_s1 + $0x64] ss:$8 sps:$4 sm:$0xff]  }
  0x11   :  { %v1426_v38 = vld [vmem:[%s2117_s1 + $0x60] ss:$8 sps:$4 sm:$0xff]   ;;  %v1427_v39 = vld [vmem:[%s2117_s1 + $0x74] ss:$8 sps:$4 sm:$0xff]   ;;  %v1429_v40 = vld [vmem:[%s2117_s1 + $0x70] ss:$8 sps:$4 sm:$0xff]  }
  0x12   :  { %v1438_v42 = vld [vmem:[%s2116_s0 + $0x60] sm:$0xff]   ;;  %v1431_v43 = vld [vmem:[%s2116_s0 + $0x8] sm:$0xff]   ;;  %v1432_v45 = vld [vmem:[%s2116_s0 + $0x10] sm:$0xff]   ;;  %v207_v58 = vshrl.u32 %v206_v57, 7 }
  0x13   :  { %395 = vmatpush1.bf16.msra.mxu0 %v1411_v28  ;;  %1398 = vmatpush1.bf16.msra.mxu1 %v1411_v28  ;;  %v1440_v44 = vld [vmem:[%s2116_s0 + $0x68] sm:$0xff]   ;;  %v1442_v46 = vld [vmem:[%s2116_s0 + $0x70] sm:$0xff]   ;;  %v1433_v47 = vld [vmem:[%s2116_s0 + $0x18] sm:$0xff]  }
  0x14   :  { %396 = vmatprep.subr.bf16.mxu0 %v1412_v29  ;;  %1391 = vmatprep.subr.bf16.mxu1 %v1412_v29  ;;  %v1444_v48 = vld [vmem:[%s2116_s0 + $0x78] sm:$0xff]   ;;  %v1434_v49 = vld [vmem:[%s2116_s0 + $0x20] sm:$0xff]   ;;  %v1435_v50 = vld [vmem:[%s2116_s0 + $0x28] sm:$0xff]   ;;  %v208_v59 = vsub.s32 0, %v207_v58  ;;  %v212_v61 = vsub.s32 1, %v207_v58 }
  0x15   :  { %v1436_v51 = vld [vmem:[%s2116_s0 + $0x30] sm:$0xff]   ;;  %v1437_v52 = vld [vmem:[%s2116_s0 + $0x38] sm:$0xff]   ;;  %v1439_v53 = vld [vmem:[%s2116_s0 + $0x40] sm:$0xff]  }
  0x16   :  { %v1441_v54 = vld [vmem:[%s2116_s0 + $0x48] sm:$0xff]   ;;  %v1443_v55 = vld [vmem:[%s2116_s0 + $0x50] sm:$0xff]   ;;  %v1445_v56 = vld [vmem:[%s2116_s0 + $0x58] sm:$0xff]  }
  0x17   :  { %397 = vmatpush1.bf16.msra.mxu0 %v1414_v30  ;;  %1399 = vmatpush1.bf16.msra.mxu1 %v1414_v30  ;;  %v204_v60 = vld [vmem:[%s2118_s2] sm:$0x3] }
  0x18   :  { %398 = vmatprep.subr.bf16.mxu0 %v1415_v31  ;;  %1392 = vmatprep.subr.bf16.mxu1 %v1415_v31  ;;  %v1726_v62 = vrot.slane %v204_v60, %v208_v59  ;;  %v1728_v63 = vrot.slane %v204_v60, %v212_v61 }
  0x1b   :  { %399 = vmatpush1.bf16.msra.mxu0 %v1417_v32  ;;  %1400 = vmatpush1.bf16.msra.mxu1 %v1417_v32 }
  0x1c   :  { %400 = vmatprep.subr.bf16.mxu0 %v1418_v33  ;;  %1393 = vmatprep.subr.bf16.mxu1 %v1418_v33 }
  0x1f   :  { %401 = vmatpush1.bf16.msra.mxu0 %v1420_v34  ;;  %1401 = vmatpush1.bf16.msra.mxu1 %v1420_v34 }
  0x20   :  { %402 = vmatprep.subr.bf16.mxu0 %v1421_v35  ;;  %1394 = vmatprep.subr.bf16.mxu1 %v1421_v35 }
  0x23   :  { %403 = vmatpush1.bf16.msra.mxu0 %v1423_v36  ;;  %1402 = vmatpush1.bf16.msra.mxu1 %v1423_v36 }
  0x24   :  { %404 = vmatprep.subr.bf16.mxu0 %v1424_v37  ;;  %1395 = vmatprep.subr.bf16.mxu1 %v1424_v37 }
  0x27   :  { %405 = vmatpush1.bf16.msra.mxu0 %v1426_v38  ;;  %1403 = vmatpush1.bf16.msra.mxu1 %v1426_v38 }
  0x28   :  { %406 = vmatprep.subr.bf16.mxu0 %v1427_v39  ;;  %1396 = vmatprep.subr.bf16.mxu1 %v1427_v39 }
  0x2b   :  { %407 = vmatpush1.bf16.msra.mxu0 %v1429_v40  ;;  %1404 = vmatpush1.bf16.msra.mxu1 %v1429_v40 }
  0x2c   :  { %1205 = vmatprep.subr.bf16.mxu1 %v1534_v8 }
  0x2e   :  { %425 = vmatmul.mubr.bf16.vlgmr.msra.gmra.mrb[0].mxu0 %v1430_v41  ;;  %545 = vmatmul.mubr.bf16.vlgmr.msra.gmra.mrb[0].mxu1 %v1438_v42 }
  0x2f   :  { %434 = vmatprep.mubr.bf16.mxu0 %v1450_v26  ;;  %554 = vmatprep.mubr.bf16.mxu1 %v1450_v26 }
  0x36   :  { %435 = vmatmul.mubr.bf16.gmra.mrb[4].mxu0 %v1431_v43  ;;  %555 = vmatmul.mubr.bf16.gmra.mrb[4].mxu1 %v1440_v44 }
  0x37   :  { %444 = vmatprep.mubr.bf16.mxu0 %v1450_v26  ;;  %564 = vmatprep.mubr.bf16.mxu1 %v1450_v26 }
  0x3e   :  { %445 = vmatmul.mubr.bf16.gmra.mrb[8].mxu0 %v1432_v45  ;;  %565 = vmatmul.mubr.bf16.gmra.mrb[8].mxu1 %v1442_v46 }
  0x3f   :  { %454 = vmatprep.mubr.bf16.mxu0 %v1450_v26  ;;  %574 = vmatprep.mubr.bf16.mxu1 %v1450_v26 }
  0x46   :  { %455 = vmatmul.mubr.bf16.gmra.mrb[12].mxu0 %v1433_v47  ;;  %575 = vmatmul.mubr.bf16.gmra.mrb[12].mxu1 %v1444_v48 }
  0x47   :  { %464 = vmatprep.mubr.bf16.mxu0 %v1450_v26 }
  0x4e   :  { %465 = vmatmul.mubr.bf16.gmra.mrb[16].mxu0 %v1434_v49 }
  0x4f   :  { %474 = vmatprep.mubr.bf16.mxu0 %v1450_v26 }
  0x56   :  { %475 = vmatmul.mubr.bf16.gmra.mrb[20].mxu0 %v1435_v50 }
  0x57   :  { %484 = vmatprep.mubr.bf16.mxu0 %v1450_v26 }
  0x5e   :  { %485 = vmatmul.mubr.bf16.gmra.mrb[24].mxu0 %v1436_v51 }
  0x5f   :  { %494 = vmatprep.mubr.bf16.mxu0 %v1450_v26 }
  0x66   :  { %495 = vmatmul.mubr.bf16.gmra.mrb[28].mxu0 %v1437_v52 }
  0x67   :  { %504 = vmatprep.mubr.bf16.mxu0 %v1450_v26 }
  0x6e   :  { %505 = vmatmul.mubr.bf16.gmra.mrb[32].mxu0 %v1439_v53 }
  0x6f   :  { %514 = vmatprep.mubr.bf16.mxu0 %v1450_v26 }
  0x76   :  { %515 = vmatmul.mubr.bf16.gmra.mrb[36].mxu0 %v1441_v54 }
  0x77   :  { %524 = vmatprep.mubr.bf16.mxu0 %v1450_v26 }
  0x7e   :  { %525 = vmatmul.mubr.bf16.gmra.mrb[40].mxu0 %v1443_v55 }
  0x7f   :  { %534 = vmatprep.mubr.bf16.mxu0 %v1450_v26 }
  0x86   :  { %535 = vmatmul.mubr.bf16.gmra.mrb[44].mxu0 %v1445_v56 }
 0x101   :  { %v426_v24 = vpop.f32.mrb[0].mxu0  ;;  %v546_v25 = vpop.f32.mrb[0].mxu1 }
 0x102   :  { %v427_v26 = vadd.f32 %v426_v24, %v1726_v62  ;;  %v428_v27 = vpop.f32.mrb[1].mxu0  ;;  %v547_v28 = vadd.f32 %v546_v25, %v1726_v62  ;;  %v548_v29 = vpop.f32.mrb[1].mxu1 }
 0x103   :  { %v429_v30 = vadd.f32 %v428_v27, %v1728_v63  ;;  %v430_v31 = vpop.f32.mrb[2].mxu0  ;;  %v549_v32 = vadd.f32 %v548_v29, %v1728_v63  ;;  %v550_v33 = vpop.f32.mrb[2].mxu1 }
 0x104   :  { %v431_v34 = vadd.f32 %v430_v31, %v1726_v62  ;;  %v432_v35 = vpop.f32.mrb[3].mxu0  ;;  %v633_v36 = vmax.f32 %v547_v28, 0.0  ;;  %v551_v37 = vadd.f32 %v550_v33, %v1726_v62  ;;  %v552_v38 = vpop.f32.mrb[3].mxu1  ;;  %v585_v42 = vmax.f32 %v427_v26, 0.0 }
 0x105   :  { %v433_v39 = vadd.f32 %v432_v35, %v1728_v63  ;;  %v634_v40 = vmax.f32 %v549_v32, 0.0  ;;  %v553_v41 = vadd.f32 %v552_v38, %v1728_v63  ;;  %v586_v45 = vmax.f32 %v429_v30, 0.0 }
 0x106   :  { %v587_v43 = vmax.f32 %v431_v34, 0.0  ;;  %v635_v44 = vmax.f32 %v551_v37, 0.0 }
 0x107   :  { %v588_v46 = vmax.f32 %v433_v39, 0.0  ;;  %v636_v47 = vmax.f32 %v553_v41, 0.0 }
 0x108   :  { %v1738_v48 = vpack.c.bf16 %v587_v43, %v585_v42  ;;  %v1740_v49 = vpack.c.bf16 %v635_v44, %v633_v36 }
 0x109   :  { %v1742_v50 = vpack.c.bf16 %v588_v46, %v586_v45  ;;  %v436_v51 = vpop.f32.mrb[4].mxu0  ;;  %v1744_v52 = vpack.c.bf16 %v636_v47, %v634_v40  ;;  %v556_v53 = vpop.f32.mrb[4].mxu1 }
 0x10a   :  { %v437_v54 = vadd.f32 %v436_v51, %v1726_v62  ;;  %v438_v55 = vpop.f32.mrb[5].mxu0  ;;  %v557_v56 = vadd.f32 %v556_v53, %v1726_v62  ;;  %v558_v57 = vpop.f32.mrb[5].mxu1 }
 0x10b   :  { %v439_v58 = vadd.f32 %v438_v55, %v1728_v63  ;;  %v440_v59 = vpop.f32.mrb[6].mxu0  ;;  %v559_v60 = vadd.f32 %v558_v57, %v1728_v63  ;;  %v560_v61 = vpop.f32.mrb[6].mxu1  ;;  %743 = vmatprep.mubr.bf16.mxu1 %v1742_v50 }
 0x10c   :  { %v441_v24 = vadd.f32 %v440_v59, %v1726_v62  ;;  %v442_v25 = vpop.f32.mrb[7].mxu0  ;;  %v637_v26 = vmax.f32 %v557_v56, 0.0  ;;  %v561_v27 = vadd.f32 %v560_v61, %v1726_v62  ;;  %v562_v28 = vpop.f32.mrb[7].mxu1  ;;  %v589_v32 = vmax.f32 %v437_v54, 0.0 }
 0x10d   :  { %v443_v29 = vadd.f32 %v442_v25, %v1728_v63  ;;  %v638_v30 = vmax.f32 %v559_v60, 0.0  ;;  %v563_v31 = vadd.f32 %v562_v28, %v1728_v63  ;;  %v590_v35 = vmax.f32 %v439_v58, 0.0 }
 0x10e   :  { %v591_v33 = vmax.f32 %v441_v24, 0.0  ;;  %v639_v34 = vmax.f32 %v561_v27, 0.0 }
 0x10f   :  { %v592_v36 = vmax.f32 %v443_v29, 0.0  ;;  %v640_v37 = vmax.f32 %v563_v31, 0.0 }
 0x110   :  { %v1754_v38 = vpack.c.bf16 %v591_v33, %v589_v32  ;;  %v1756_v39 = vpack.c.bf16 %v639_v34, %v637_v26 }
 0x111   :  { %v1758_v40 = vpack.c.bf16 %v592_v36, %v590_v35  ;;  %v446_v41 = vpop.f32.mrb[8].mxu0  ;;  %v1760_v42 = vpack.c.bf16 %v640_v37, %v638_v30  ;;  %v566_v43 = vpop.f32.mrb[8].mxu1 }
 0x112   :  { %v447_v44 = vadd.f32 %v446_v41, %v1726_v62  ;;  %v448_v45 = vpop.f32.mrb[9].mxu0  ;;  %v567_v46 = vadd.f32 %v566_v43, %v1726_v62  ;;  %v568_v47 = vpop.f32.mrb[9].mxu1 }
 0x113   :  { %v449_v51 = vadd.f32 %v448_v45, %v1728_v63  ;;  %v450_v53 = vpop.f32.mrb[10].mxu0  ;;  %v569_v54 = vadd.f32 %v568_v47, %v1728_v63  ;;  %v570_v55 = vpop.f32.mrb[10].mxu1 }
 0x114   :  { %v451_v56 = vadd.f32 %v450_v53, %v1726_v62  ;;  %v452_v57 = vpop.f32.mrb[11].mxu0  ;;  %v641_v58 = vmax.f32 %v567_v46, 0.0  ;;  %v571_v59 = vadd.f32 %v570_v55, %v1726_v62  ;;  %v572_v60 = vpop.f32.mrb[11].mxu1  ;;  %v593_v26 = vmax.f32 %v447_v44, 0.0 }
 0x115   :  { %v453_v61 = vadd.f32 %v452_v57, %v1728_v63  ;;  %v642_v24 = vmax.f32 %v569_v54, 0.0  ;;  %v573_v25 = vadd.f32 %v572_v60, %v1728_v63  ;;  %v594_v29 = vmax.f32 %v449_v51, 0.0 }
 0x116   :  { %v595_v27 = vmax.f32 %v451_v56, 0.0  ;;  %v643_v28 = vmax.f32 %v571_v59, 0.0 }
 0x117   :  { %v596_v30 = vmax.f32 %v453_v61, 0.0  ;;  %v644_v31 = vmax.f32 %v573_v25, 0.0 }
 0x118   :  { %v1770_v32 = vpack.c.bf16 %v595_v27, %v593_v26  ;;  %v1772_v33 = vpack.c.bf16 %v643_v28, %v641_v58 }
 0x119   :  { %v1774_v34 = vpack.c.bf16 %v596_v30, %v594_v29  ;;  %v456_v35 = vpop.f32.mrb[12].mxu0  ;;  %v1776_v36 = vpack.c.bf16 %v644_v31, %v642_v24  ;;  %v576_v37 = vpop.f32.mrb[12].mxu1 }
 0x11a   :  { %v457_v41 = vadd.f32 %v456_v35, %v1726_v62  ;;  %v458_v43 = vpop.f32.mrb[13].mxu0  ;;  %v577_v44 = vadd.f32 %v576_v37, %v1726_v62  ;;  %v578_v45 = vpop.f32.mrb[13].mxu1 }
 0x11b   :  { %v459_v46 = vadd.f32 %v458_v43, %v1728_v63  ;;  %v460_v47 = vpop.f32.mrb[14].mxu0  ;;  %v579_v51 = vadd.f32 %v578_v45, %v1728_v63  ;;  %v580_v53 = vpop.f32.mrb[14].mxu1 }
 0x11c   :  { %v461_v54 = vadd.f32 %v460_v47, %v1726_v62  ;;  %v462_v55 = vpop.f32.mrb[15].mxu0  ;;  %v645_v56 = vmax.f32 %v577_v44, 0.0  ;;  %v581_v57 = vadd.f32 %v580_v53, %v1726_v62  ;;  %v582_v58 = vpop.f32.mrb[15].mxu1  ;;  %v597_v24 = vmax.f32 %v457_v41, 0.0 }
 0x11d   :  { %v463_v59 = vadd.f32 %v462_v55, %v1728_v63  ;;  %v646_v60 = vmax.f32 %v579_v51, 0.0  ;;  %v583_v61 = vadd.f32 %v582_v58, %v1728_v63  ;;  %v598_v27 = vmax.f32 %v459_v46, 0.0 }
 0x11e   :  { %v599_v25 = vmax.f32 %v461_v54, 0.0  ;;  %v647_v26 = vmax.f32 %v581_v57, 0.0 }
 0x11f   :  { %v600_v28 = vmax.f32 %v463_v59, 0.0  ;;  %v648_v29 = vmax.f32 %v583_v61, 0.0 }
 0x120   :  { %v1786_v30 = vpack.c.bf16 %v599_v25, %v597_v24  ;;  %v1788_v31 = vpack.c.bf16 %v647_v26, %v645_v56 }
 0x121   :  { %v1790_v35 = vpack.c.bf16 %v600_v28, %v598_v27  ;;  %v466_v37 = vpop.f32.mrb[16].mxu0  ;;  %v1792_v43 = vpack.c.bf16 %v648_v29, %v646_v60 }
 0x122   :  { %2140 = vst [vmem:[#allocation17_spill] sm:$0xff] %v1788_v31  ;;  %v467_v44 = vadd.f32 %v466_v37, %v1726_v62  ;;  %v468_v45 = vpop.f32.mrb[17].mxu0 }
 0x123   :  { %2141 = vst [vmem:[#allocation18_spill] sm:$0xff] %v1792_v43  ;;  %v469_v47 = vadd.f32 %v468_v45, %v1728_v63  ;;  %v470_v41 = vpop.f32.mrb[18].mxu0 }
 0x124   :  { %v471_v51 = vadd.f32 %v470_v41, %v1726_v62  ;;  %v472_v46 = vpop.f32.mrb[19].mxu0  ;;  %v601_v54 = vmax.f32 %v467_v44, 0.0 }
 0x125   :  { %v473_v53 = vadd.f32 %v472_v46, %v1728_v63  ;;  %v602_v56 = vmax.f32 %v469_v47, 0.0 }
 0x126   :  { %v603_v55 = vmax.f32 %v471_v51, 0.0 }
 0x127   :  { %v604_v57 = vmax.f32 %v473_v53, 0.0 }
 0x128   :  { %v1798_v58 = vpack.c.bf16 %v603_v55, %v601_v54 }
 0x129   :  { %v1800_v59 = vpack.c.bf16 %v604_v57, %v602_v56  ;;  %v476_v60 = vpop.f32.mrb[20].mxu0 }
 0x12a   :  { %v477_v61 = vadd.f32 %v476_v60, %v1726_v62  ;;  %v478_v24 = vpop.f32.mrb[21].mxu0 }
 0x12b   :  { %v479_v25 = vadd.f32 %v478_v24, %v1728_v63  ;;  %v480_v26 = vpop.f32.mrb[22].mxu0 }
 0x12c   :  { %v481_v27 = vadd.f32 %v480_v26, %v1726_v62  ;;  %v482_v28 = vpop.f32.mrb[23].mxu0  ;;  %v605_v37 = vmax.f32 %v477_v61, 0.0 }
 0x12d   :  { %v483_v29 = vadd.f32 %v482_v28, %v1728_v63  ;;  %v606_v45 = vmax.f32 %v479_v25, 0.0 }
 0x12e   :  { %v607_v44 = vmax.f32 %v481_v27, 0.0 }
 0x12f   :  { %v608_v47 = vmax.f32 %v483_v29, 0.0 }
 0x130   :  { %v1806_v41 = vpack.c.bf16 %v607_v44, %v605_v37 }
 0x131   :  { %v1808_v51 = vpack.c.bf16 %v608_v47, %v606_v45  ;;  %v486_v46 = vpop.f32.mrb[24].mxu0 }
 0x132   :  { %v487_v53 = vadd.f32 %v486_v46, %v1726_v62  ;;  %v488_v54 = vpop.f32.mrb[25].mxu0 }
 0x133   :  { %v489_v55 = vadd.f32 %v488_v54, %v1728_v63  ;;  %v490_v56 = vpop.f32.mrb[26].mxu0 }
 0x134   :  { %v491_v57 = vadd.f32 %v490_v56, %v1726_v62  ;;  %v492_v60 = vpop.f32.mrb[27].mxu0  ;;  %v609_v61 = vmax.f32 %v487_v53, 0.0 }
 0x135   :  { %v493_v24 = vadd.f32 %v492_v60, %v1728_v63  ;;  %v610_v25 = vmax.f32 %v489_v55, 0.0 }
 0x136   :  { %v611_v26 = vmax.f32 %v491_v57, 0.0 }
 0x137   :  { %v612_v27 = vmax.f32 %v493_v24, 0.0 }
 0x138   :  { %v1814_v28 = vpack.c.bf16 %v611_v26, %v609_v61 }
 0x139   :  { %v1816_v29 = vpack.c.bf16 %v612_v27, %v610_v25  ;;  %v496_v37 = vpop.f32.mrb[28].mxu0 }
 0x13a   :  { %v497_v44 = vadd.f32 %v496_v37, %v1726_v62  ;;  %v498_v45 = vpop.f32.mrb[29].mxu0 }
 0x13b   :  { %v499_v47 = vadd.f32 %v498_v45, %v1728_v63  ;;  %v500_v46 = vpop.f32.mrb[30].mxu0 }
 0x13c   :  { %v501_v54 = vadd.f32 %v500_v46, %v1726_v62  ;;  %v502_v56 = vpop.f32.mrb[31].mxu0  ;;  %v613_v53 = vmax.f32 %v497_v44, 0.0 }
 0x13d   :  { %v503_v60 = vadd.f32 %v502_v56, %v1728_v63  ;;  %v614_v55 = vmax.f32 %v499_v47, 0.0 }
 0x13e   :  { %v615_v57 = vmax.f32 %v501_v54, 0.0 }
 0x13f   :  { %v616_v24 = vmax.f32 %v503_v60, 0.0 }
 0x140   :  { %v1822_v61 = vpack.c.bf16 %v615_v57, %v613_v53 }
 0x141   :  { %v1824_v26 = vpack.c.bf16 %v616_v24, %v614_v55  ;;  %v506_v25 = vpop.f32.mrb[32].mxu0 }
 0x142   :  { %v507_v27 = vadd.f32 %v506_v25, %v1726_v62  ;;  %v508_v37 = vpop.f32.mrb[33].mxu0 }
 0x143   :  { %v509_v45 = vadd.f32 %v508_v37, %v1728_v63  ;;  %v510_v23 = vpop.f32.mrb[34].mxu0 }
 0x144   :  { %v511_v46 = vadd.f32 %v510_v23, %v1726_v62  ;;  %v512_v22 = vpop.f32.mrb[35].mxu0  ;;  %v617_v44 = vmax.f32 %v507_v27, 0.0 }
 0x145   :  { %v513_v56 = vadd.f32 %v512_v22, %v1728_v63  ;;  %v618_v47 = vmax.f32 %v509_v45, 0.0 }
 0x146   :  { %v619_v54 = vmax.f32 %v511_v46, 0.0 }
 0x147   :  { %v620_v60 = vmax.f32 %v513_v56, 0.0 }
 0x148   :  { %v1830_v53 = vpack.c.bf16 %v619_v54, %v617_v44 }
 0x149   :  { %v1832_v57 = vpack.c.bf16 %v620_v60, %v618_v47  ;;  %v516_v55 = vpop.f32.mrb[36].mxu0 }
 0x14a   :  { %v517_v24 = vadd.f32 %v516_v55, %v1726_v62  ;;  %v518_v25 = vpop.f32.mrb[37].mxu0 }
 0x14b   :  { %v519_v37 = vadd.f32 %v518_v25, %v1728_v63  ;;  %v520_v21 = vpop.f32.mrb[38].mxu0 }
 0x14c   :  { %v521_v23 = vadd.f32 %v520_v21, %v1726_v62  ;;  %v522_v20 = vpop.f32.mrb[39].mxu0  ;;  %v621_v27 = vmax.f32 %v517_v24, 0.0 }
 0x14d   :  { %v523_v22 = vadd.f32 %v522_v20, %v1728_v63  ;;  %v622_v45 = vmax.f32 %v519_v37, 0.0 }
 0x14e   :  { %v623_v46 = vmax.f32 %v521_v23, 0.0 }
 0x14f   :  { %v624_v56 = vmax.f32 %v523_v22, 0.0 }
 0x150   :  { %v1838_v44 = vpack.c.bf16 %v623_v46, %v621_v27 }
 0x151   :  { %v1840_v54 = vpack.c.bf16 %v624_v56, %v622_v45  ;;  %v526_v47 = vpop.f32.mrb[40].mxu0 }
 0x152   :  { %v527_v60 = vadd.f32 %v526_v47, %v1726_v62  ;;  %v528_v55 = vpop.f32.mrb[41].mxu0 }
 0x153   :  { %v529_v25 = vadd.f32 %v528_v55, %v1728_v63  ;;  %v530_v19 = vpop.f32.mrb[42].mxu0 }
 0x154   :  { %v531_v21 = vadd.f32 %v530_v19, %v1726_v62  ;;  %v532_v18 = vpop.f32.mrb[43].mxu0  ;;  %v625_v24 = vmax.f32 %v527_v60, 0.0 }
 0x155   :  { %v533_v20 = vadd.f32 %v532_v18, %v1728_v63  ;;  %v626_v37 = vmax.f32 %v529_v25, 0.0 }
 0x156   :  { %v627_v23 = vmax.f32 %v531_v21, 0.0 }
 0x157   :  { %v628_v22 = vmax.f32 %v533_v20, 0.0 }
 0x158   :  { %v669_v27 = vpack.c.bf16 %v627_v23, %v625_v24 }
 0x159   :  { %v670_v46 = vpack.c.bf16 %v628_v22, %v626_v37  ;;  %v536_v45 = vpop.f32.mrb[44].mxu0 }
 0x15a   :  { %v537_v56 = vadd.f32 %v536_v45, %v1726_v62  ;;  %v538_v17 = vpop.f32.mrb[45].mxu0 }
 0x15b   :  { %v539_v47 = vadd.f32 %v538_v17, %v1728_v63  ;;  %v540_v16 = vpop.f32.mrb[46].mxu0 }
 0x15c   :  { %v541_v55 = vadd.f32 %v540_v16, %v1726_v62  ;;  %v542_v31 = vpop.f32.mrb[47].mxu0  ;;  %v629_v43 = vmax.f32 %v537_v56, 0.0 }
 0x15d   :  { %v543_v19 = vadd.f32 %v542_v31, %v1728_v63  ;;  %v630_v60 = vmax.f32 %v539_v47, 0.0 }
 0x15e   :  { %v631_v18 = vmax.f32 %v541_v55, 0.0 }
 0x15f   :  { %v632_v21 = vmax.f32 %v543_v19, 0.0 }
 0x160   :  { %v671_v25 = vpack.c.bf16 %v631_v18, %v629_v43 }
 0x161   :  { %v672_v20 = vpack.c.bf16 %v632_v21, %v630_v60 }
 0x162   :  { %1446 = dma.done.wait [#allocation4], 2048 }
 0x163   :  { %1447 = vsyncadd [#allocation4], 4294965248  ;;  %1206 = vmatpush3.bf16.msra.mxu1 %v1494_v0  ;;  %v2142_v0 = vld [vmem:[#allocation18_spill] sm:$0xff] }
 0x164   :  { %1207 = vmatprep.subr.bf16.mxu1 %v1539_v9 }
 0x167   :  { %1208 = vmatpush3.bf16.msra.mxu1 %v1499_v1  ;;  %v2143_v1 = vld [vmem:[#allocation17_spill] sm:$0xff] }
 0x168   :  { %1209 = vmatprep.subr.bf16.mxu1 %v1544_v10 }
 0x16b   :  { %1210 = vmatpush3.bf16.msra.mxu1 %v1504_v2 }
 0x16c   :  { %1211 = vmatprep.subr.bf16.mxu1 %v1549_v11 }
 0x16f   :  { %1212 = vmatpush3.bf16.msra.mxu1 %v1509_v3  ;;  %v1897_v3 = vld [vmem:[%s2120_s4] ss:$0 sm:$0xff] }
 0x170   :  { %1213 = vmatprep.subr.bf16.mxu1 %v1554_v12 }
 0x173   :  { %1214 = vmatpush3.bf16.msra.mxu1 %v1514_v4 }
 0x174   :  { %1215 = vmatprep.subr.bf16.mxu1 %v1559_v13 }
 0x177   :  { %1216 = vmatpush3.bf16.msra.mxu1 %v1519_v5 }
 0x178   :  { %1217 = vmatprep.subr.bf16.mxu1 %v1564_v14 }
 0x17b   :  { %1218 = vmatpush3.bf16.msra.mxu1 %v1524_v6 }
 0x17c   :  { %1219 = vmatprep.subr.bf16.mxu1 %v1569_v15 }
 0x17f   :  { %1220 = vmatpush3.bf16.msra.mxu1 %v1529_v7 }
 0x182   :  { %744 = vmatmul.mubr.bf16.vlgmr.msra.gmra.mrb[16].mxu1 %v1738_v48 }
 0x183   :  { %751 = vmatprep.mubr.bf16.mxu1 %v1758_v40 }
 0x18a   :  { %752 = vmatmul.mubr.bf16.gmra.mrb[20].mxu1 %v1754_v38 }
 0x18b   :  { %759 = vmatprep.mubr.bf16.mxu1 %v1774_v34 }
 0x192   :  { %760 = vmatmul.mubr.bf16.gmra.mrb[24].mxu1 %v1770_v32 }
 0x193   :  { %767 = vmatprep.mubr.bf16.mxu1 %v1790_v35 }
 0x19a   :  { %768 = vmatmul.mubr.bf16.gmra.mrb[28].mxu1 %v1786_v30 }
 0x19b   :  { %775 = vmatprep.mubr.bf16.mxu1 %v1800_v59 }
 0x1a2   :  { %776 = vmatmul.mubr.bf16.gmra.mrb[32].mxu1 %v1798_v58 }
 0x1a3   :  { %783 = vmatprep.mubr.bf16.mxu1 %v1808_v51 }
 0x1aa   :  { %784 = vmatmul.mubr.bf16.gmra.mrb[36].mxu1 %v1806_v41 }
 0x1ab   :  { %791 = vmatprep.mubr.bf16.mxu1 %v1816_v29 }
 0x1b2   :  { %792 = vmatmul.mubr.bf16.gmra.mrb[40].mxu1 %v1814_v28 }
 0x1b3   :  { %799 = vmatprep.mubr.bf16.mxu1 %v1824_v26 }
 0x1ba   :  { %800 = vmatmul.mubr.bf16.gmra.mrb[44].mxu1 %v1822_v61 }
 0x1bb   :  { %807 = vmatprep.mubr.bf16.mxu1 %v1832_v57 }
 0x1c2   :  { %808 = vmatmul.mubr.bf16.gmra.mrb[48].mxu1 %v1830_v53 }
 0x1c3   :  { %815 = vmatprep.mubr.bf16.mxu1 %v1840_v54 }
 0x1ca   :  { %816 = vmatmul.mubr.bf16.gmra.mrb[52].mxu1 %v1838_v44 }
 0x1cb   :  { %823 = vmatprep.mubr.bf16.mxu1 %v670_v46 }
 0x1d2   :  { %824 = vmatmul.mubr.bf16.gmra.mrb[56].mxu1 %v669_v27 }
 0x1d3   :  { %831 = vmatprep.mubr.bf16.mxu1 %v672_v20 }
 0x1da   :  { %832 = vmatmul.mubr.bf16.gmra.mrb[60].mxu1 %v671_v25 }
 0x1db   :  { %839 = vmatprep.mubr.bf16.mxu1 %v1744_v52 }
 0x1e2   :  { %840 = vmatmul.mubr.bf16.gmra.mrb[64].mxu1 %v1740_v49 }
 0x1e3   :  { %847 = vmatprep.mubr.bf16.mxu1 %v1760_v42 }
 0x1ea   :  { %848 = vmatmul.mubr.bf16.gmra.mrb[68].mxu1 %v1756_v39 }
 0x1eb   :  { %855 = vmatprep.mubr.bf16.mxu1 %v1776_v36 }
 0x1f2   :  { %856 = vmatmul.mubr.bf16.gmra.mrb[72].mxu1 %v1772_v33 }
 0x1f3   :  { %863 = vmatprep.mubr.bf16.mxu1 %v2142_v0 }
 0x1fa   :  { %864 = vmatmul.mubr.bf16.gmra.mrb[76].mxu1 %v2143_v1 }
 0x255   :  { %v1221_v2 = vpop.f32.mrb[16].mxu1 }
 0x256   :  { %v1222_v4 = vpop.f32.mrb[17].mxu1 }
 0x257   :  { %v1223_v5 = vadd.f32 %v1222_v4, %v1221_v2  ;;  %v1224_v6 = vpop.f32.mrb[18].mxu1 }
 0x258   :  { %v1225_v7 = vpop.f32.mrb[19].mxu1 }
 0x259   :  { %v746_v8 = vadd.f32 %v1223_v5, %v1897_v3  ;;  %v1226_v9 = vadd.f32 %v1225_v7, %v1224_v6 }
 0x25b   :  { %v749_v10 = vadd.f32 %v1226_v9, %v1897_v3  ;;  %v872_v11 = vmax.f32 %v746_v8, 0.0 }
 0x25d   :  { %v873_v12 = vmax.f32 %v749_v10, 0.0  ;;  %v1227_v13 = vpop.f32.mrb[20].mxu1 }
 0x25e   :  { %v1228_v14 = vpop.f32.mrb[21].mxu1 }
 0x25f   :  { %v1901_v15 = vpack.c.bf16 %v873_v12, %v872_v11  ;;  %v1229_v16 = vadd.f32 %v1228_v14, %v1227_v13  ;;  %v1230_v17 = vpop.f32.mrb[22].mxu1 }
 0x260   :  { %v1231_v62 = vpop.f32.mrb[23].mxu1 }
 0x261   :  { %v754_v63 = vadd.f32 %v1229_v16, %v1897_v3  ;;  %v1232_v48 = vadd.f32 %v1231_v62, %v1230_v17  ;;  %1357 = vmatprep.mubr.bf16.mxu0 %v1901_v15 }
 0x263   :  { %v757_v49 = vadd.f32 %v1232_v48, %v1897_v3  ;;  %v874_v50 = vmax.f32 %v754_v63, 0.0 }
 0x265   :  { %v875_v52 = vmax.f32 %v757_v49, 0.0  ;;  %v1233_v38 = vpop.f32.mrb[24].mxu1 }
 0x266   :  { %v1234_v39 = vpop.f32.mrb[25].mxu1 }
 0x267   :  { %v1905_v40 = vpack.c.bf16 %v875_v52, %v874_v50  ;;  %v1235_v42 = vadd.f32 %v1234_v39, %v1233_v38  ;;  %v1236_v32 = vpop.f32.mrb[26].mxu1 }
 0x268   :  { %v1237_v33 = vpop.f32.mrb[27].mxu1 }
 0x269   :  { %v762_v34 = vadd.f32 %v1235_v42, %v1897_v3  ;;  %v1238_v36 = vadd.f32 %v1237_v33, %v1236_v32 }
 0x26b   :  { %v765_v30 = vadd.f32 %v1238_v36, %v1897_v3  ;;  %v876_v31 = vmax.f32 %v762_v34, 0.0 }
 0x26d   :  { %v877_v35 = vmax.f32 %v765_v30, 0.0  ;;  %v1239_v43 = vpop.f32.mrb[28].mxu1 }
 0x26e   :  { %v1240_v58 = vpop.f32.mrb[29].mxu1 }
 0x26f   :  { %v1909_v59 = vpack.c.bf16 %v877_v35, %v876_v31  ;;  %v1241_v41 = vadd.f32 %v1240_v58, %v1239_v43  ;;  %v1242_v51 = vpop.f32.mrb[30].mxu1 }
 0x270   :  { %v1243_v28 = vpop.f32.mrb[31].mxu1 }
 0x271   :  { %v770_v29 = vadd.f32 %v1241_v41, %v1897_v3  ;;  %v1244_v61 = vadd.f32 %v1243_v28, %v1242_v51 }
 0x273   :  { %v773_v26 = vadd.f32 %v1244_v61, %v1897_v3  ;;  %v878_v53 = vmax.f32 %v770_v29, 0.0 }
 0x275   :  { %v879_v57 = vmax.f32 %v773_v26, 0.0  ;;  %v1245_v44 = vpop.f32.mrb[32].mxu1 }
 0x276   :  { %v1246_v54 = vpop.f32.mrb[33].mxu1 }
 0x277   :  { %v1913_v24 = vpack.c.bf16 %v879_v57, %v878_v53  ;;  %v1247_v23 = vadd.f32 %v1246_v54, %v1245_v44  ;;  %v1248_v37 = vpop.f32.mrb[34].mxu1 }
 0x278   :  { %v1249_v22 = vpop.f32.mrb[35].mxu1 }
 0x279   :  { %v778_v27 = vadd.f32 %v1247_v23, %v1897_v3  ;;  %v1250_v46 = vadd.f32 %v1249_v22, %v1248_v37 }
 0x27b   :  { %v781_v45 = vadd.f32 %v1250_v46, %v1897_v3  ;;  %v880_v56 = vmax.f32 %v778_v27, 0.0 }
 0x27d   :  { %v881_v47 = vmax.f32 %v781_v45, 0.0  ;;  %v1251_v55 = vpop.f32.mrb[36].mxu1 }
 0x27e   :  { %v1252_v19 = vpop.f32.mrb[37].mxu1 }
 0x27f   :  { %v1917_v18 = vpack.c.bf16 %v881_v47, %v880_v56  ;;  %v1253_v60 = vadd.f32 %v1252_v19, %v1251_v55  ;;  %v1254_v21 = vpop.f32.mrb[38].mxu1 }
 0x280   :  { %v1255_v25 = vpop.f32.mrb[39].mxu1 }
 0x281   :  { %v786_v20 = vadd.f32 %v1253_v60, %v1897_v3  ;;  %v1256_v0 = vadd.f32 %v1255_v25, %v1254_v21 }
 0x283   :  { %v789_v1 = vadd.f32 %v1256_v0, %v1897_v3  ;;  %v882_v2 = vmax.f32 %v786_v20, 0.0 }
 0x285   :  { %v883_v4 = vmax.f32 %v789_v1, 0.0  ;;  %v1257_v5 = vpop.f32.mrb[40].mxu1 }
 0x286   :  { %v1258_v6 = vpop.f32.mrb[41].mxu1 }
 0x287   :  { %v1921_v7 = vpack.c.bf16 %v883_v4, %v882_v2  ;;  %v1259_v8 = vadd.f32 %v1258_v6, %v1257_v5  ;;  %v1260_v9 = vpop.f32.mrb[42].mxu1 }
 0x288   :  { %v1261_v10 = vpop.f32.mrb[43].mxu1 }
 0x289   :  { %v794_v11 = vadd.f32 %v1259_v8, %v1897_v3  ;;  %v1262_v12 = vadd.f32 %v1261_v10, %v1260_v9 }
 0x28b   :  { %v797_v13 = vadd.f32 %v1262_v12, %v1897_v3  ;;  %v884_v14 = vmax.f32 %v794_v11, 0.0 }
 0x28d   :  { %v885_v16 = vmax.f32 %v797_v13, 0.0  ;;  %v1263_v17 = vpop.f32.mrb[44].mxu1 }
 0x28e   :  { %v1264_v62 = vpop.f32.mrb[45].mxu1 }
 0x28f   :  { %v1925_v63 = vpack.c.bf16 %v885_v16, %v884_v14  ;;  %v1265_v48 = vadd.f32 %v1264_v62, %v1263_v17  ;;  %v1266_v49 = vpop.f32.mrb[46].mxu1 }
 0x290   :  { %v1267_v50 = vpop.f32.mrb[47].mxu1 }
 0x291   :  { %v802_v52 = vadd.f32 %v1265_v48, %v1897_v3  ;;  %v1268_v38 = vadd.f32 %v1267_v50, %v1266_v49 }
 0x293   :  { %v805_v39 = vadd.f32 %v1268_v38, %v1897_v3  ;;  %v886_v42 = vmax.f32 %v802_v52, 0.0 }
 0x295   :  { %v887_v32 = vmax.f32 %v805_v39, 0.0  ;;  %v1269_v33 = vpop.f32.mrb[48].mxu1 }
 0x296   :  { %v1270_v34 = vpop.f32.mrb[49].mxu1 }
 0x297   :  { %v1929_v36 = vpack.c.bf16 %v887_v32, %v886_v42  ;;  %v1271_v30 = vadd.f32 %v1270_v34, %v1269_v33  ;;  %v1272_v31 = vpop.f32.mrb[50].mxu1 }
 0x298   :  { %v1273_v35 = vpop.f32.mrb[51].mxu1 }
 0x299   :  { %v810_v43 = vadd.f32 %v1271_v30, %v1897_v3  ;;  %v1274_v58 = vadd.f32 %v1273_v35, %v1272_v31 }
 0x29b   :  { %v813_v41 = vadd.f32 %v1274_v58, %v1897_v3  ;;  %v888_v51 = vmax.f32 %v810_v43, 0.0 }
 0x29d   :  { %v889_v28 = vmax.f32 %v813_v41, 0.0  ;;  %v1275_v29 = vpop.f32.mrb[52].mxu1 }
 0x29e   :  { %v1276_v61 = vpop.f32.mrb[53].mxu1 }
 0x29f   :  { %v1933_v26 = vpack.c.bf16 %v889_v28, %v888_v51  ;;  %v1277_v53 = vadd.f32 %v1276_v61, %v1275_v29  ;;  %v1278_v57 = vpop.f32.mrb[54].mxu1 }
 0x2a0   :  { %v1279_v44 = vpop.f32.mrb[55].mxu1 }
 0x2a1   :  { %v818_v54 = vadd.f32 %v1277_v53, %v1897_v3  ;;  %v1280_v23 = vadd.f32 %v1279_v44, %v1278_v57 }
 0x2a3   :  { %v821_v37 = vadd.f32 %v1280_v23, %v1897_v3  ;;  %v890_v22 = vmax.f32 %v818_v54, 0.0 }
 0x2a5   :  { %v891_v27 = vmax.f32 %v821_v37, 0.0  ;;  %v1281_v46 = vpop.f32.mrb[56].mxu1 }
 0x2a6   :  { %v1282_v45 = vpop.f32.mrb[57].mxu1 }
 0x2a7   :  { %v1937_v56 = vpack.c.bf16 %v891_v27, %v890_v22  ;;  %v1283_v47 = vadd.f32 %v1282_v45, %v1281_v46  ;;  %v1284_v55 = vpop.f32.mrb[58].mxu1 }
 0x2a8   :  { %v1285_v19 = vpop.f32.mrb[59].mxu1 }
 0x2a9   :  { %v826_v60 = vadd.f32 %v1283_v47, %v1897_v3  ;;  %v1286_v21 = vadd.f32 %v1285_v19, %v1284_v55 }
 0x2ab   :  { %v829_v25 = vadd.f32 %v1286_v21, %v1897_v3  ;;  %v892_v20 = vmax.f32 %v826_v60, 0.0 }
 0x2ad   :  { %v893_v0 = vmax.f32 %v829_v25, 0.0  ;;  %v1287_v1 = vpop.f32.mrb[60].mxu1 }
 0x2ae   :  { %v1288_v2 = vpop.f32.mrb[61].mxu1 }
 0x2af   :  { %v1941_v4 = vpack.c.bf16 %v893_v0, %v892_v20  ;;  %v1289_v5 = vadd.f32 %v1288_v2, %v1287_v1  ;;  %v1290_v6 = vpop.f32.mrb[62].mxu1 }
 0x2b0   :  { %v1291_v8 = vpop.f32.mrb[63].mxu1 }
 0x2b1   :  { %v834_v9 = vadd.f32 %v1289_v5, %v1897_v3  ;;  %v1292_v10 = vadd.f32 %v1291_v8, %v1290_v6  ;;  %v2144_v6 = vld [vmem:[#allocation9_spill] sm:$0xff] }
 0x2b2   :  { %1341 = vmatprep.subr.bf16.mxu0 %v2144_v6 }
 0x2b3   :  { %v837_v11 = vadd.f32 %v1292_v10, %v1897_v3  ;;  %v894_v12 = vmax.f32 %v834_v9, 0.0 }
 0x2b5   :  { %v895_v13 = vmax.f32 %v837_v11, 0.0  ;;  %v1293_v14 = vpop.f32.mrb[64].mxu1 }
 0x2b6   :  { %v1294_v16 = vpop.f32.mrb[65].mxu1 }
 0x2b7   :  { %v1945_v17 = vpack.c.bf16 %v895_v13, %v894_v12  ;;  %v1295_v62 = vadd.f32 %v1294_v16, %v1293_v14  ;;  %v1296_v48 = vpop.f32.mrb[66].mxu1 }
 0x2b8   :  { %v1297_v49 = vpop.f32.mrb[67].mxu1 }
 0x2b9   :  { %v842_v50 = vadd.f32 %v1295_v62, %v1897_v3  ;;  %v1298_v52 = vadd.f32 %v1297_v49, %v1296_v48 }
 0x2bb   :  { %v845_v38 = vadd.f32 %v1298_v52, %v1897_v3  ;;  %v896_v39 = vmax.f32 %v842_v50, 0.0 }
 0x2bd   :  { %v897_v42 = vmax.f32 %v845_v38, 0.0  ;;  %v1299_v32 = vpop.f32.mrb[68].mxu1 }
 0x2be   :  { %v1300_v33 = vpop.f32.mrb[69].mxu1 }
 0x2bf   :  { %v916_v34 = vpack.c.bf16 %v897_v42, %v896_v39  ;;  %v1301_v30 = vadd.f32 %v1300_v33, %v1299_v32  ;;  %v1302_v31 = vpop.f32.mrb[70].mxu1 }
 0x2c0   :  { %v1303_v35 = vpop.f32.mrb[71].mxu1 }
 0x2c1   :  { %v850_v43 = vadd.f32 %v1301_v30, %v1897_v3  ;;  %v1304_v58 = vadd.f32 %v1303_v35, %v1302_v31 }
 0x2c3   :  { %v853_v41 = vadd.f32 %v1304_v58, %v1897_v3  ;;  %v898_v51 = vmax.f32 %v850_v43, 0.0 }
 0x2c5   :  { %v899_v28 = vmax.f32 %v853_v41, 0.0  ;;  %v1305_v29 = vpop.f32.mrb[72].mxu1 }
 0x2c6   :  { %v1306_v61 = vpop.f32.mrb[73].mxu1 }
 0x2c7   :  { %v917_v53 = vpack.c.bf16 %v899_v28, %v898_v51  ;;  %v1307_v57 = vadd.f32 %v1306_v61, %v1305_v29  ;;  %v1308_v44 = vpop.f32.mrb[74].mxu1 }
 0x2c8   :  { %v1309_v54 = vpop.f32.mrb[75].mxu1 }
 0x2c9   :  { %v858_v23 = vadd.f32 %v1307_v57, %v1897_v3  ;;  %v1310_v37 = vadd.f32 %v1309_v54, %v1308_v44 }
 0x2cb   :  { %v861_v22 = vadd.f32 %v1310_v37, %v1897_v3  ;;  %v900_v27 = vmax.f32 %v858_v23, 0.0 }
 0x2cd   :  { %v901_v46 = vmax.f32 %v861_v22, 0.0  ;;  %v1311_v45 = vpop.f32.mrb[76].mxu1 }
 0x2ce   :  { %v1312_v47 = vpop.f32.mrb[77].mxu1 }
 0x2cf   :  { %v918_v55 = vpack.c.bf16 %v901_v46, %v900_v27  ;;  %v1313_v19 = vadd.f32 %v1312_v47, %v1311_v45  ;;  %v1314_v60 = vpop.f32.mrb[78].mxu1 }
 0x2d0   :  { %v1315_v21 = vpop.f32.mrb[79].mxu1 }
 0x2d1   :  { %v866_v25 = vadd.f32 %v1313_v19, %v1897_v3  ;;  %v1316_v20 = vadd.f32 %v1315_v21, %v1314_v60 }
 0x2d3   :  { %v869_v0 = vadd.f32 %v1316_v20, %v1897_v3  ;;  %v902_v1 = vmax.f32 %v866_v25, 0.0 }
 0x2d5   :  { %v903_v2 = vmax.f32 %v869_v0, 0.0 }
 0x2d7   :  { %v919_v5 = vpack.c.bf16 %v903_v2, %v902_v1 }
 0x2d8   :  { %1448 = dma.done.wait [#allocation4 + $0x1], 1024 }
 0x2d9   :  { %1449 = vsyncadd [#allocation4 + $0x1], 4294966272  ;;  %1342 = vmatpush3.bf16.msra.mxu0 %v2144_v6  ;;  %v2145_v8 = vld [vmem:[#allocation10_spill] sm:$0xff]  ;;  %v2146_v9 = vld [vmem:[#allocation11_spill] sm:$0xff] }
 0x2da   :  { %1343 = vmatprep.subr.bf16.mxu0 %v2145_v8  ;;  %v2147_v3 = vld [vmem:[#allocation12_spill] sm:$0xff]  ;;  %v2148_v10 = vld [vmem:[#allocation13_spill] sm:$0xff]  ;;  %v2149_v15 = vld [vmem:[#allocation14_spill] sm:$0xff] }
 0x2db   :  { %v2150_v11 = vld [vmem:[#allocation15_spill] sm:$0xff]  ;;  %v2151_v12 = vld [vmem:[#allocation16_spill] sm:$0xff] }
 0x2dd   :  { %1344 = vmatpush3.bf16.msra.mxu0 %v2145_v8 }
 0x2de   :  { %1345 = vmatprep.subr.bf16.mxu0 %v2146_v9 }
 0x2e1   :  { %1346 = vmatpush3.bf16.msra.mxu0 %v2146_v9 }
 0x2e2   :  { %1347 = vmatprep.subr.bf16.mxu0 %v2147_v3 }
 0x2e5   :  { %1348 = vmatpush3.bf16.msra.mxu0 %v2147_v3 }
 0x2e6   :  { %1349 = vmatprep.subr.bf16.mxu0 %v2148_v10 }
 0x2e9   :  { %1350 = vmatpush3.bf16.msra.mxu0 %v2148_v10 }
 0x2ea   :  { %1351 = vmatprep.subr.bf16.mxu0 %v2149_v15 }
 0x2ed   :  { %1352 = vmatpush3.bf16.msra.mxu0 %v2149_v15 }
 0x2ee   :  { %1353 = vmatprep.subr.bf16.mxu0 %v2150_v11 }
 0x2f1   :  { %1354 = vmatpush3.bf16.msra.mxu0 %v2150_v11 }
 0x2f2   :  { %1355 = vmatprep.subr.bf16.mxu0 %v2151_v12 }
 0x2f5   :  { %1356 = vmatpush3.bf16.msra.mxu0 %v2151_v12 }
 0x2f8   :  { %1358 = vmatmul.mubr.bf16.vlgmr.msra.gmra.mrb[48].mxu0 %v1905_v40  ;;  %v1986_v40 = vld [vmem:[%s2122_s6] ss:$0 sm:$0xff] }
 0x2f9   :  { %1361 = vmatprep.mubr.bf16.mxu0 %v1909_v59 }
 0x300   :  { %1362 = vmatmul.mubr.bf16.gmra.mrb[52].mxu0 %v1913_v24 }
 0x301   :  { %1365 = vmatprep.mubr.bf16.mxu0 %v1917_v18 }
 0x308   :  { %1366 = vmatmul.mubr.bf16.gmra.mrb[56].mxu0 %v1921_v7 }
 0x309   :  { %1369 = vmatprep.mubr.bf16.mxu0 %v1925_v63 }
 0x310   :  { %1370 = vmatmul.mubr.bf16.gmra.mrb[60].mxu0 %v1929_v36 }
 0x311   :  { %1373 = vmatprep.mubr.bf16.mxu0 %v1933_v26 }
 0x318   :  { %1374 = vmatmul.mubr.bf16.gmra.mrb[64].mxu0 %v1937_v56 }
 0x319   :  { %1377 = vmatprep.mubr.bf16.mxu0 %v1941_v4 }
 0x320   :  { %1378 = vmatmul.mubr.bf16.gmra.mrb[68].mxu0 %v1945_v17 }
 0x321   :  { %1381 = vmatprep.mubr.bf16.mxu0 %v916_v34 }
 0x328   :  { %1382 = vmatmul.mubr.bf16.gmra.mrb[72].mxu0 %v917_v53 }
 0x329   :  { %1385 = vmatprep.mubr.bf16.mxu0 %v918_v55 }
 0x330   :  { %1386 = vmatmul.mubr.bf16.gmra.mrb[76].mxu0 %v919_v5 }
 0x3cb   :  { %v1359_v59 = vpop.f32.mrb[48].mxu0 }
 0x3cc   :  { %v986_v24 = vadd.f32 %v1359_v59, %v1986_v40  ;;  %v977_v18 = vpop.f32.mrb[49].mxu0 }
 0x3cd   :  { %v978_v7 = vadd.f32 %v1986_v40, %v977_v18  ;;  %v1360_v63 = vpop.f32.mrb[50].mxu0 }
 0x3ce   :  { %1106 = vst [vmem:[%s2123_s7 + $0x10] sm:$0xff] %v986_v24  ;;  %v989_v36 = vadd.f32 %v1360_v63, %v1986_v40  ;;  %v980_v26 = vpop.f32.mrb[51].mxu0 }
 0x3cf   :  { %1104 = vst [vmem:[%s2123_s7] sm:$0xff] %v978_v7  ;;  %v981_v56 = vadd.f32 %v1986_v40, %v980_v26 }
 0x3d0   :  { %1107 = vst [vmem:[%s2123_s7 + $0x18] sm:$0xff] %v989_v36 }
 0x3d1   :  { %1105 = vst [vmem:[%s2123_s7 + $0x8] sm:$0xff] %v981_v56 }
 0x3d3   :  { %v1363_v4 = vpop.f32.mrb[52].mxu0 }
 0x3d4   :  { %v1002_v13 = vadd.f32 %v1363_v4, %v1986_v40  ;;  %v993_v14 = vpop.f32.mrb[53].mxu0 }
 0x3d5   :  { %v994_v16 = vadd.f32 %v1986_v40, %v993_v14  ;;  %v1364_v17 = vpop.f32.mrb[54].mxu0 }
 0x3d6   :  { %1110 = vst [vmem:[%s2123_s7 + $0x30] sm:$0xff] %v1002_v13  ;;  %v1005_v62 = vadd.f32 %v1364_v17, %v1986_v40  ;;  %v996_v48 = vpop.f32.mrb[55].mxu0 }
 0x3d7   :  { %1108 = vst [vmem:[%s2123_s7 + $0x20] sm:$0xff] %v994_v16  ;;  %v997_v49 = vadd.f32 %v1986_v40, %v996_v48 }
 0x3d8   :  { %1111 = vst [vmem:[%s2123_s7 + $0x38] sm:$0xff] %v1005_v62 }
 0x3d9   :  { %1109 = vst [vmem:[%s2123_s7 + $0x28] sm:$0xff] %v997_v49 }
 0x3db   :  { %v1367_v50 = vpop.f32.mrb[56].mxu0 }
 0x3dc   :  { %v1018_v52 = vadd.f32 %v1367_v50, %v1986_v40  ;;  %v1009_v38 = vpop.f32.mrb[57].mxu0 }
 0x3dd   :  { %v1010_v39 = vadd.f32 %v1986_v40, %v1009_v38  ;;  %v1368_v42 = vpop.f32.mrb[58].mxu0 }
 0x3de   :  { %1114 = vst [vmem:[%s2123_s7 + $0x50] sm:$0xff] %v1018_v52  ;;  %v1021_v32 = vadd.f32 %v1368_v42, %v1986_v40  ;;  %v1012_v33 = vpop.f32.mrb[59].mxu0 }
 0x3df   :  { %1112 = vst [vmem:[%s2123_s7 + $0x40] sm:$0xff] %v1010_v39  ;;  %v1013_v34 = vadd.f32 %v1986_v40, %v1012_v33 }
 0x3e0   :  { %1115 = vst [vmem:[%s2123_s7 + $0x58] sm:$0xff] %v1021_v32 }
 0x3e1   :  { %1113 = vst [vmem:[%s2123_s7 + $0x48] sm:$0xff] %v1013_v34 }
 0x3e3   :  { %v1371_v30 = vpop.f32.mrb[60].mxu0 }
 0x3e4   :  { %v1034_v31 = vadd.f32 %v1371_v30, %v1986_v40  ;;  %v1025_v35 = vpop.f32.mrb[61].mxu0 }
 0x3e5   :  { %v1026_v43 = vadd.f32 %v1986_v40, %v1025_v35  ;;  %v1372_v58 = vpop.f32.mrb[62].mxu0 }
 0x3e6   :  { %1118 = vst [vmem:[%s2123_s7 + $0x70] sm:$0xff] %v1034_v31  ;;  %v1037_v41 = vadd.f32 %v1372_v58, %v1986_v40  ;;  %v1028_v51 = vpop.f32.mrb[63].mxu0 }
 0x3e7   :  { %1116 = vst [vmem:[%s2123_s7 + $0x60] sm:$0xff] %v1026_v43  ;;  %v1029_v28 = vadd.f32 %v1986_v40, %v1028_v51 }
 0x3e8   :  { %1119 = vst [vmem:[%s2123_s7 + $0x78] sm:$0xff] %v1037_v41 }
 0x3e9   :  { %1117 = vst [vmem:[%s2123_s7 + $0x68] sm:$0xff] %v1029_v28 }
 0x3eb   :  { %v1375_v29 = vpop.f32.mrb[64].mxu0 }
 0x3ec   :  { %v1050_v61 = vadd.f32 %v1375_v29, %v1986_v40  ;;  %v1041_v53 = vpop.f32.mrb[65].mxu0 }
 0x3ed   :  { %v1042_v57 = vadd.f32 %v1986_v40, %v1041_v53  ;;  %v1376_v44 = vpop.f32.mrb[66].mxu0 }
 0x3ee   :  { %1122 = vst [vmem:[%s2123_s7 + $0x90] sm:$0xff] %v1050_v61  ;;  %v1053_v54 = vadd.f32 %v1376_v44, %v1986_v40  ;;  %v1044_v23 = vpop.f32.mrb[67].mxu0 }
 0x3ef   :  { %1120 = vst [vmem:[%s2123_s7 + $0x80] sm:$0xff] %v1042_v57  ;;  %v1045_v37 = vadd.f32 %v1986_v40, %v1044_v23 }
 0x3f0   :  { %1123 = vst [vmem:[%s2123_s7 + $0x98] sm:$0xff] %v1053_v54 }
 0x3f1   :  { %1121 = vst [vmem:[%s2123_s7 + $0x88] sm:$0xff] %v1045_v37 }
 0x3f3   :  { %v1379_v22 = vpop.f32.mrb[68].mxu0 }
 0x3f4   :  { %v1066_v27 = vadd.f32 %v1379_v22, %v1986_v40  ;;  %v1057_v46 = vpop.f32.mrb[69].mxu0 }
 0x3f5   :  { %v1058_v45 = vadd.f32 %v1986_v40, %v1057_v46  ;;  %v1380_v47 = vpop.f32.mrb[70].mxu0 }
 0x3f6   :  { %1126 = vst [vmem:[%s2123_s7 + $0xb0] sm:$0xff] %v1066_v27  ;;  %v1069_v55 = vadd.f32 %v1380_v47, %v1986_v40  ;;  %v1060_v19 = vpop.f32.mrb[71].mxu0 }
 0x3f7   :  { %1124 = vst [vmem:[%s2123_s7 + $0xa0] sm:$0xff] %v1058_v45  ;;  %v1061_v60 = vadd.f32 %v1986_v40, %v1060_v19 }
 0x3f8   :  { %1127 = vst [vmem:[%s2123_s7 + $0xb8] sm:$0xff] %v1069_v55 }
 0x3f9   :  { %1125 = vst [vmem:[%s2123_s7 + $0xa8] sm:$0xff] %v1061_v60 }
 0x3fb   :  { %v1383_v21 = vpop.f32.mrb[72].mxu0 }
 0x3fc   :  { %v1082_v25 = vadd.f32 %v1383_v21, %v1986_v40  ;;  %v1073_v20 = vpop.f32.mrb[73].mxu0 }
 0x3fd   :  { %v1074_v0 = vadd.f32 %v1986_v40, %v1073_v20  ;;  %v1384_v1 = vpop.f32.mrb[74].mxu0 }
 0x3fe   :  { %1130 = vst [vmem:[%s2123_s7 + $0xd0] sm:$0xff] %v1082_v25  ;;  %v1085_v2 = vadd.f32 %v1384_v1, %v1986_v40  ;;  %v1076_v5 = vpop.f32.mrb[75].mxu0 }
 0x3ff   :  { %1128 = vst [vmem:[%s2123_s7 + $0xc0] sm:$0xff] %v1074_v0  ;;  %v1077_v6 = vadd.f32 %v1986_v40, %v1076_v5 }
 0x400   :  { %1131 = vst [vmem:[%s2123_s7 + $0xd8] sm:$0xff] %v1085_v2 }
 0x401   :  { %1129 = vst [vmem:[%s2123_s7 + $0xc8] sm:$0xff] %v1077_v6 }
 0x403   :  { %v1387_v8 = vpop.f32.mrb[76].mxu0 }
 0x404   :  { %v1098_v9 = vadd.f32 %v1387_v8, %v1986_v40  ;;  %v1089_v3 = vpop.f32.mrb[77].mxu0 }
 0x405   :  { %v1090_v10 = vadd.f32 %v1986_v40, %v1089_v3  ;;  %v1388_v15 = vpop.f32.mrb[78].mxu0 }
 0x406   :  { %1134 = vst [vmem:[%s2123_s7 + $0xf0] sm:$0xff] %v1098_v9  ;;  %v1101_v11 = vadd.f32 %v1388_v15, %v1986_v40  ;;  %v1092_v12 = vpop.f32.mrb[79].mxu0 }
 0x407   :  { %1132 = vst [vmem:[%s2123_s7 + $0xe0] sm:$0xff] %v1090_v10  ;;  %v1093_v59 = vadd.f32 %v1986_v40, %v1092_v12 }
 0x408   :  { %1135 = vst [vmem:[%s2123_s7 + $0xf8] sm:$0xff] %v1101_v11 }
 0x409   :  { %1133 = vst [vmem:[%s2123_s7 + $0xe8] sm:$0xff] %v1093_v59 }
 0x40a   :  { %1140 = vsyncmov [#allocation4] }
 0x40d   :  { %s1141_s6 = vpop.sfrf %1140 }
 0x40e   :  { %p1203_p0 = scmp.ne.s32.totalorder %s1141_s6, 0 }
 0x410   :  { %1145 = shalt.err (%p1203_p0)  }
 0x411   :  { %1147 = vsyncmov [#allocation4 + $0x1] }
 0x414   :  { %s1148_s19 = vpop.sfrf %1147 }
 0x415   :  { %p1204_p1 = scmp.ne.s32.totalorder %s1148_s19, 0 }
 0x417   :  { %1152 = shalt.err (%p1204_p1)  }

</bundles_post_ra>
